<compile_context>
chip_gen: v6e
topology: v6e:2x2x1
jax: 0.10.0
libtpu: 0.0.40
codegen_flags: <defaults>
</compile_context>

<pallas_src>
import functools

import jax
import jax.numpy as jnp
from jax import lax
from jax.experimental import pallas as pl
from jax.experimental.pallas import tpu as pltpu


_NEG = -1e30  # finite "-inf" sentinel for padded rows (NaN-safe)


def _round_up(a, b):
    return (a + b - 1) // b * b


def _device_defaults():
    """(default tile rows, vmem_limit_bytes) tuned per TPU generation."""
    try:
        info = pltpu.get_tpu_info()
        if getattr(info, "vmem_capacity_bytes", 0) >= 96 * (1 << 20):
            # v5e / v6e: 128 MiB VMEM -> fatter tiles, bigger scoped limit.
            return 2048, 96 * (1 << 20)
    except Exception:
        pass
    # v7x (64 MiB VMEM) or unknown: conservative.
    return 1024, 48 * (1 << 20)


def _const_spec(shape, index_map):
    """BlockSpec for a block that never changes: single-buffer if supported."""
    buffered = getattr(pl, "Buffered", None)
    if buffered is not None:
        try:
            return pl.BlockSpec(shape, index_map, pipeline_mode=buffered(1))
        except TypeError:
            pass
    return pl.BlockSpec(shape, index_map)


def _attn_cls_kernel(nv_ref, x_ref, wvu_ref, bvu_ref, wwt_ref, bw_ref,
                     wc_ref, bc_ref, out_ref, m_scr, l_scr, acc_scr, *,
                     tn, d_pad, k, compute_dtype):
    i = pl.program_id(0)
    nsteps = pl.num_programs(0)

    @pl.when(i == 0)
    def _init():
        m_scr[...] = jnp.full_like(m_scr, _NEG)
        l_scr[...] = jnp.zeros_like(l_scr)
        acc_scr[...] = jnp.zeros_like(acc_scr)

    x = x_ref[...]                       # (tn, L) in its native dtype
    xc = x.astype(compute_dtype)         # MXU input dtype (no-op if equal)

    # Fused V|U projection: one MXU pass over the x tile, f32 accumulation.
    h = jnp.dot(xc, wvu_ref[...], preferred_element_type=jnp.float32) \
        + bvu_ref[...]                                       # (tn, 2*d_pad) f32
    # d_pad is a multiple of 128 -> lane-aligned split, no relayout copies.
    a_v = jnp.tanh(h[:, :d_pad])
    a_u = 0.5 * (jnp.tanh(0.5 * h[:, d_pad:]) + 1.0)         # sigmoid, 1 EUP op
    gated = a_v * a_u                                        # (tn, d_pad) f32

    wwt = wwt_ref[...]                                       # (K, d_pad) f32
    if k == 1:
        # K == 1: VPU multiply + lane reduce; skip a 1-wide MXU matmul.
        logits = jnp.sum(gated * wwt, axis=-1, keepdims=True) + bw_ref[...]
    else:
        logits = lax.dot_general(gated, wwt, (((1,), (1,)), ((), ())),
                                 preferred_element_type=jnp.float32) + bw_ref[...]

    # Mask rows that exist only because of padding to a tile multiple.
    n_valid = nv_ref[0]
    row = i * tn + lax.broadcasted_iota(jnp.int32, (tn, 1), 0)
    valid = row < n_valid
    logits = jnp.where(valid, logits, _NEG)

    # Online softmax over the instance axis (finite sentinel + masked p is
    # NaN-safe even if a whole tile is padding).
    m_old = m_scr[...]                                               # (1, K)
    m_new = jnp.maximum(m_old, jnp.max(logits, axis=0, keepdims=True))
    alpha = jnp.exp(m_old - m_new)                                   # (1, K)
    p = jnp.where(valid, jnp.exp(logits - m_new), 0.0)               # (tn, K)
    l_scr[...] = alpha * l_scr[...] + jnp.sum(p, axis=0, keepdims=True)
    m_scr[...] = m_new

    if k == 1:
        # Broadcast-mul in x's dtype (bf16 VPU on v6e/v7x), f32 accumulation.
        contrib = jnp.sum(p.astype(x.dtype) * x, axis=0, keepdims=True,
                          dtype=jnp.float32)                         # (1, L)
        acc_scr[...] = alpha * acc_scr[...] + contrib
    else:
        contrib = lax.dot_general(p.astype(x.dtype), x,
                                  (((0,), (0,)), ((), ())),
                                  preferred_element_type=jnp.float32)  # (K, L)
        acc_scr[...] = alpha.T * acc_scr[...] + contrib

    @pl.when(i == nsteps - 1)
    def _finalize():
        if k == 1:
            afeat = acc_scr[...] / l_scr[...]                        # (1, L)
        else:
            afeat = acc_scr[...] / l_scr[...].T                      # (K, L)
        out_ref[...] = (jnp.dot(afeat, wc_ref[...],
                                preferred_element_type=jnp.float32) + bc_ref[...])


def prepare_params(wv, bv, wu, bu, ww, bw, wc, bc, *,
                   compute_dtype=jnp.bfloat16):
    """One-time weight prep (hoisted out of the per-bag call).

    Linear weights are in (in, out) layout, biases (1, out).  Fuses Wv|Wu into
    a single (L, 2*d_pad) matrix with D zero-padded to a multiple of 128.
    """
    L, D = wv.shape
    K = ww.shape[1]
    d_pad = _round_up(D, 128)

    def pad_cols(w, b):
        if d_pad != D:
            w = jnp.pad(w, ((0, 0), (0, d_pad - D)))
            b = jnp.pad(b, ((0, 0), (0, d_pad - D)))
        return w, b

    wv_p, bv_p = pad_cols(wv, bv)
    wu_p, bu_p = pad_cols(wu, bu)
    wvu = jnp.concatenate([wv_p, wu_p], axis=1).astype(compute_dtype)  # (L, 2*d_pad)
    bvu = jnp.concatenate([bv_p, bu_p], axis=1).astype(jnp.float32)    # (1, 2*d_pad)
    ww_t = jnp.transpose(ww)                                           # (K, D)
    if d_pad != D:
        ww_t = jnp.pad(ww_t, ((0, 0), (0, d_pad - D)))
    return dict(
        wvu=wvu, bvu=bvu, ww_t=ww_t.astype(jnp.float32),
        bw=bw.astype(jnp.float32), wc=wc.astype(jnp.float32),
        bc=bc.astype(jnp.float32),
        L=L, K=K, d_pad=d_pad, compute_dtype=compute_dtype)


def attention_with_classifier(x, params, *, tn=None):
    """x: (N, L) at its native dtype.  Returns pred: (K, num_cls) float32."""
    N, L = x.shape
    K = params["K"]
    d_pad = params["d_pad"]
    num_cls = params["wc"].shape[1]
    compute_dtype = params["compute_dtype"]

    default_tn, vmem_limit = _device_defaults()
    if tn is None:
        tn = default_tn
    # Multiple of 16 (bf16 sublane pack); never larger than the padded bag.
    tn = max(16, min(tn, _round_up(max(N, 1), 16)))
    tn = _round_up(tn, 16)
    n_pad = _round_up(max(N, 1), tn)
    # x stays in its native dtype; only the (< tn)-row remainder is padded.
    x_p = x if n_pad == N else jnp.pad(x, ((0, n_pad - N), (0, 0)))
    n_tiles = n_pad // tn
    n_valid = jnp.array([N], dtype=jnp.int32)

    kernel = functools.partial(_attn_cls_kernel, tn=tn, d_pad=d_pad, k=K,
                               compute_dtype=compute_dtype)
    const = lambda i, nv: (0, 0)   # weights/biases/output: resident across steps

    grid_spec = pltpu.PrefetchScalarGridSpec(
        num_scalar_prefetch=1,
        grid=(n_tiles,),
        in_specs=[
            pl.BlockSpec((tn, L), lambda i, nv: (i, 0)),       # x: streamed
            _const_spec((L, 2 * d_pad), const),                # fused Wv|Wu
            _const_spec((1, 2 * d_pad), const),                # fused bv|bu
            _const_spec((K, d_pad), const),                    # Ww^T (padded)
            _const_spec((1, K), const),                        # bw
            _const_spec((L, num_cls), const),                  # Wc
            _const_spec((1, num_cls), const),                  # bc
        ],
        out_specs=pl.BlockSpec((K, num_cls), const),
        scratch_shapes=[
            pltpu.VMEM((1, K), jnp.float32),                   # running max m
            pltpu.VMEM((1, K), jnp.float32),                   # running denom l
            pltpu.VMEM((K, L), jnp.float32),                   # afeat accumulator
        ],
    )

    return pl.pallas_call(
        kernel,
        out_shape=jax.ShapeDtypeStruct((K, num_cls), jnp.float32),
        grid_spec=grid_spec,
        compiler_params=pltpu.CompilerParams(
            dimension_semantics=("arbitrary",),                # N is a reduction
            vmem_limit_bytes=vmem_limit,
        ),
    )(n_valid, x_p, params["wvu"], params["bvu"], params["ww_t"],
      params["bw"], params["wc"], params["bc"])


def init_params(key, L, D, K, num_cls):
    """Deterministic synthetic parameters (PyTorch Linear shapes, pre-transposed)."""
    ks = jax.random.split(key, 8)

    def lin(kw, kb, fan_in, fan_out):
        bound = 1.0 / (fan_in ** 0.5)
        w = jax.random.uniform(kw, (fan_in, fan_out), jnp.float32, -bound, bound)
        b = jax.random.uniform(kb, (1, fan_out), jnp.float32, -bound, bound)
        return w, b

    wv, bv = lin(ks[0], ks[1], L, D)        # attention_V
    wu, bu = lin(ks[2], ks[3], L, D)        # attention_U
    ww, bw = lin(ks[4], ks[5], D, K)        # attention_weights
    wc, bc = lin(ks[6], ks[7], L, num_cls)  # classifier fc
    return wv, bv, wu, bu, ww, bw, wc, bc


def reference(x, wv, bv, wu, bu, ww, bw, wc, bc):
    a_v = jnp.tanh(x @ wv + bv)
    a_u = jax.nn.sigmoid(x @ wu + bu)
    a = (a_v * a_u) @ ww + bw           # (N, K)
    aa = jax.nn.softmax(a.T, axis=1)    # (K, N)
    afeat = aa @ x                      # (K, L)
    return afeat @ wc + bc              # (K, num_cls)


if __name__ == "__main__":
    # Small shapes consistent with the module: one bag of N instances with L
    # features each.  N chosen so the tiled path runs multiple grid steps with
    # a masked partial last tile.
    N, L, D, K, NUM_CLS = 40, 32, 16, 1, 2

    key = jax.random.PRNGKey(0)
    kx, kp = jax.random.split(key)
    x = jax.random.normal(kx, (N, L), dtype=jnp.float32)
    raw = init_params(kp, L, D, K, NUM_CLS)
    ref = reference(x, *raw)

    # f32 compute path, tiny tile: tight check of the tiled online softmax
    # (3 grid steps, last tile partially masked).
    prep_f32 = prepare_params(*raw, compute_dtype=jnp.float32)
    pred_f32 = jax.block_until_ready(
        attention_with_classifier(x, prep_f32, tn=16))
    assert pred_f32.shape == (K, NUM_CLS)
    assert jnp.allclose(pred_f32, ref, atol=5e-3, rtol=5e-3), (pred_f32, ref)

    # Default path: bf16 MXU inputs, f32 accumulation, device-default tile.
    prep_bf16 = prepare_params(*raw, compute_dtype=jnp.bfloat16)
    pred_bf16 = jax.block_until_ready(
        attention_with_classifier(x, prep_bf16))
    assert pred_bf16.shape == (K, NUM_CLS)
    assert jnp.allclose(pred_bf16, ref, atol=5e-2, rtol=5e-2), (pred_bf16, ref)

    print("KERNEL_OK")
</pallas_src>

<mosaic_0001>
module attributes {stable_mosaic.version = 11 : i64} {
  func.func @_attn_cls_kernel(%arg0: i32, %arg1: memref<1xi32, #tpu.memory_space<smem>>, %arg2: memref<16x32xf32, #tpu.memory_space<vmem>>, %arg3: memref<32x256xf32, #tpu.memory_space<vmem>>, %arg4: memref<1x256xf32, #tpu.memory_space<vmem>>, %arg5: memref<1x128xf32, #tpu.memory_space<vmem>>, %arg6: memref<1x1xf32, #tpu.memory_space<vmem>>, %arg7: memref<32x2xf32, #tpu.memory_space<vmem>>, %arg8: memref<1x2xf32, #tpu.memory_space<vmem>>, %arg9: memref<1x2xf32, #tpu.memory_space<vmem>>, %arg10: memref<1x1xf32, #tpu.memory_space<vmem>>, %arg11: memref<1x1xf32, #tpu.memory_space<vmem>>, %arg12: memref<1x32xf32, #tpu.memory_space<vmem>>) attributes {dimension_semantics = [#tpu.dimension_semantics<arbitrary>], iteration_bounds = array<i64: 3>, scalar_prefetch = 1 : i64, scratch_operands = 3 : i64, tpu.core_type = #tpu.core_type<tc>, window_params = [{transform_indices = @transform_0, window_bounds = array<i64: 16, 32>}, {pipeline_mode = #tpu.pipeline_mode<synchronous>, transform_indices = @transform_1, window_bounds = array<i64: 32, 256>}, {pipeline_mode = #tpu.pipeline_mode<synchronous>, transform_indices = @transform_2, window_bounds = array<i64: 1, 256>}, {pipeline_mode = #tpu.pipeline_mode<synchronous>, transform_indices = @transform_3, window_bounds = array<i64: 1, 128>}, {pipeline_mode = #tpu.pipeline_mode<synchronous>, transform_indices = @transform_4, window_bounds = array<i64: 1, 1>}, {pipeline_mode = #tpu.pipeline_mode<synchronous>, transform_indices = @transform_5, window_bounds = array<i64: 32, 2>}, {pipeline_mode = #tpu.pipeline_mode<synchronous>, transform_indices = @transform_6, window_bounds = array<i64: 1, 2>}, {pipeline_mode = #tpu.pipeline_mode<synchronous>, transform_indices = @transform_7, window_bounds = array<i64: 1, 2>}]} {
    %c0_i32 = arith.constant 0 : i32
    %0 = arith.cmpi eq, %arg0, %c0_i32 : i32
    %1 = arith.extui %0 : i1 to i32
    %c0_i32_0 = arith.constant 0 : i32
    %2 = arith.cmpi ne, %1, %c0_i32_0 : i32
    scf.if %2 {
      %cst_33 = arith.constant -1.000000e+30 : f32
      %67 = vector.broadcast %cst_33 : f32 to vector<1x1xf32>
      %c0_34 = arith.constant 0 : index
      %c0_35 = arith.constant 0 : index
      %68 = vector.load %arg10[%c0_34, %c0_35] : memref<1x1xf32, #tpu.memory_space<vmem>>, vector<1x1xf32>
      tpu.vector_store %arg10[%c0_34, %c0_35], %67 {strides = array<i32>} : memref<1x1xf32, #tpu.memory_space<vmem>>, vector<1x1xf32>,
      %cst_36 = arith.constant 0.000000e+00 : f32
      %69 = vector.broadcast %cst_36 : f32 to vector<1x1xf32>
      %c0_37 = arith.constant 0 : index
      %c0_38 = arith.constant 0 : index
      %70 = vector.load %arg11[%c0_37, %c0_38] : memref<1x1xf32, #tpu.memory_space<vmem>>, vector<1x1xf32>
      tpu.vector_store %arg11[%c0_37, %c0_38], %69 {strides = array<i32>} : memref<1x1xf32, #tpu.memory_space<vmem>>, vector<1x1xf32>,
      %cst_39 = arith.constant 0.000000e+00 : f32
      %71 = vector.broadcast %cst_39 : f32 to vector<1x32xf32>
      %c0_40 = arith.constant 0 : index
      %c0_41 = arith.constant 0 : index
      %72 = vector.load %arg12[%c0_40, %c0_41] : memref<1x32xf32, #tpu.memory_space<vmem>>, vector<1x32xf32>
      tpu.vector_store %arg12[%c0_40, %c0_41], %71 {strides = array<i32>} : memref<1x32xf32, #tpu.memory_space<vmem>>, vector<1x32xf32>,
    } else {
    }
    %c0 = arith.constant 0 : index
    %c0_1 = arith.constant 0 : index
    %3 = vector.load %arg2[%c0, %c0_1] : memref<16x32xf32, #tpu.memory_space<vmem>>, vector<16x32xf32>
    %c0_2 = arith.constant 0 : index
    %c0_3 = arith.constant 0 : index
    %4 = vector.load %arg3[%c0_2, %c0_3] : memref<32x256xf32, #tpu.memory_space<vmem>>, vector<32x256xf32>
    %cst = arith.constant dense<0.000000e+00> : vector<16x256xf32>
    %5 = tpu.matmul %3, %4, %cst {dimension_numbers = #tpu.dot_dimension_numbers<[1], [0], [0], [1], [0, 0, 1, 1], [], []>} : vector<16x32xf32>, vector<32x256xf32>, vector<16x256xf32> -> vector<16x256xf32>
    %c0_4 = arith.constant 0 : index
    %c0_5 = arith.constant 0 : index
    %6 = vector.load %arg4[%c0_4, %c0_5] : memref<1x256xf32, #tpu.memory_space<vmem>>, vector<1x256xf32>
    %7 = vector.broadcast %6 : vector<1x256xf32> to vector<16x256xf32>
    %8 = arith.addf %5, %7 : vector<16x256xf32>
    %9 = vector.extract_strided_slice %8 {offsets = [0, 0], sizes = [16, 128], strides = [1, 1]} : vector<16x256xf32> to vector<16x128xf32>
    %10 = math.tanh %9 : vector<16x128xf32>
    %11 = vector.extract_strided_slice %8 {offsets = [0, 128], sizes = [16, 128], strides = [1, 1]} : vector<16x256xf32> to vector<16x128xf32>
    %cst_6 = arith.constant 5.000000e-01 : f32
    %12 = vector.broadcast %cst_6 : f32 to vector<16x128xf32>
    %13 = arith.mulf %12, %11 : vector<16x128xf32>
    %14 = math.tanh %13 : vector<16x128xf32>
    %cst_7 = arith.constant 1.000000e+00 : f32
    %15 = vector.broadcast %cst_7 : f32 to vector<16x128xf32>
    %16 = arith.addf %14, %15 : vector<16x128xf32>
    %cst_8 = arith.constant 5.000000e-01 : f32
    %17 = vector.broadcast %cst_8 : f32 to vector<16x128xf32>
    %18 = arith.mulf %17, %16 : vector<16x128xf32>
    %19 = arith.mulf %10, %18 : vector<16x128xf32>
    %c0_9 = arith.constant 0 : index
    %c0_10 = arith.constant 0 : index
    %20 = vector.load %arg5[%c0_9, %c0_10] : memref<1x128xf32, #tpu.memory_space<vmem>>, vector<1x128xf32>
    %21 = vector.broadcast %20 : vector<1x128xf32> to vector<16x128xf32>
    %22 = arith.mulf %19, %21 : vector<16x128xf32>
    %cst_11 = arith.constant dense<0.000000e+00> : vector<16xf32>
    %23 = vector.multi_reduction <add>, %22, %cst_11 [1] : vector<16x128xf32> to vector<16xf32>
    %24 = vector.shape_cast %23 : vector<16xf32> to vector<16x1xf32>
    %c0_12 = arith.constant 0 : index
    %c0_13 = arith.constant 0 : index
    %25 = vector.load %arg6[%c0_12, %c0_13] : memref<1x1xf32, #tpu.memory_space<vmem>>, vector<1x1xf32>
    %26 = vector.broadcast %25 : vector<1x1xf32> to vector<16x1xf32>
    %27 = arith.addf %24, %26 : vector<16x1xf32>
    %c0_14 = arith.constant 0 : index
    %28 = memref.load %arg1[%c0_14] : memref<1xi32, #tpu.memory_space<smem>>
    %c16_i32 = arith.constant 16 : i32
    %29 = arith.muli %arg0, %c16_i32 : i32
    %30 = tpu.iota {dimensions = array<i32: 0>} : vector<16x1xi32>
    %31 = vector.broadcast %29 : i32 to vector<16x1xi32>
    %32 = arith.addi %31, %30 : vector<16x1xi32>
    %33 = vector.broadcast %28 : i32 to vector<16x1xi32>
    %34 = arith.cmpi slt, %32, %33 : vector<16x1xi32>
    %cst_15 = arith.constant -1.000000e+30 : f32
    %35 = vector.broadcast %cst_15 : f32 to vector<16x1xf32>
    %36 = arith.select %34, %27, %35 : vector<16x1xi1>, vector<16x1xf32>
    %c0_16 = arith.constant 0 : index
    %c0_17 = arith.constant 0 : index
    %37 = vector.load %arg10[%c0_16, %c0_17] : memref<1x1xf32, #tpu.memory_space<vmem>>, vector<1x1xf32>
    %cst_18 = arith.constant dense<0xFF800000> : vector<1xf32>
    %38 = vector.multi_reduction <maximumf>, %36, %cst_18 [0] : vector<16x1xf32> to vector<1xf32>
    %39 = vector.shape_cast %38 : vector<1xf32> to vector<1x1xf32>
    %40 = arith.maximumf %37, %39 : vector<1x1xf32>
    %41 = arith.subf %37, %40 : vector<1x1xf32>
    %42 = math.exp %41 : vector<1x1xf32>
    %43 = vector.broadcast %40 : vector<1x1xf32> to vector<16x1xf32>
    %44 = arith.subf %36, %43 : vector<16x1xf32>
    %45 = math.exp %44 : vector<16x1xf32>
    %cst_19 = arith.constant 0.000000e+00 : f32
    %46 = vector.broadcast %cst_19 : f32 to vector<16x1xf32>
    %47 = arith.select %34, %45, %46 : vector<16x1xi1>, vector<16x1xf32>
    %c0_20 = arith.constant 0 : index
    %c0_21 = arith.constant 0 : index
    %48 = vector.load %arg11[%c0_20, %c0_21] : memref<1x1xf32, #tpu.memory_space<vmem>>, vector<1x1xf32>
    %49 = arith.mulf %42, %48 : vector<1x1xf32>
    %cst_22 = arith.constant dense<0.000000e+00> : vector<1xf32>
    %50 = vector.multi_reduction <add>, %47, %cst_22 [0] : vector<16x1xf32> to vector<1xf32>
    %51 = vector.shape_cast %50 : vector<1xf32> to vector<1x1xf32>
    %52 = arith.addf %49, %51 : vector<1x1xf32>
    %c0_23 = arith.constant 0 : index
    %c0_24 = arith.constant 0 : index
    %53 = vector.load %arg11[%c0_23, %c0_24] : memref<1x1xf32, #tpu.memory_space<vmem>>, vector<1x1xf32>
    tpu.vector_store %arg11[%c0_23, %c0_24], %52 {strides = array<i32>} : memref<1x1xf32, #tpu.memory_space<vmem>>, vector<1x1xf32>,
    %c0_25 = arith.constant 0 : index
    %c0_26 = arith.constant 0 : index
    %54 = vector.load %arg10[%c0_25, %c0_26] : memref<1x1xf32, #tpu.memory_space<vmem>>, vector<1x1xf32>
    tpu.vector_store %arg10[%c0_25, %c0_26], %40 {strides = array<i32>} : memref<1x1xf32, #tpu.memory_space<vmem>>, vector<1x1xf32>,
    %55 = vector.broadcast %47 : vector<16x1xf32> to vector<16x32xf32>
    %56 = arith.mulf %55, %3 : vector<16x32xf32>
    %cst_27 = arith.constant dense<0.000000e+00> : vector<32xf32>
    %57 = vector.multi_reduction <add>, %56, %cst_27 [0] : vector<16x32xf32> to vector<32xf32>
    %58 = vector.shape_cast %57 : vector<32xf32> to vector<1x32xf32>
    %c0_28 = arith.constant 0 : index
    %c0_29 = arith.constant 0 : index
    %59 = vector.load %arg12[%c0_28, %c0_29] : memref<1x32xf32, #tpu.memory_space<vmem>>, vector<1x32xf32>
    %60 = vector.broadcast %42 : vector<1x1xf32> to vector<1x32xf32>
    %61 = arith.mulf %60, %59 : vector<1x32xf32>
    %62 = arith.addf %61, %58 : vector<1x32xf32>
    %c0_30 = arith.constant 0 : index
    %c0_31 = arith.constant 0 : index
    %63 = vector.load %arg12[%c0_30, %c0_31] : memref<1x32xf32, #tpu.memory_space<vmem>>, vector<1x32xf32>
    tpu.vector_store %arg12[%c0_30, %c0_31], %62 {strides = array<i32>} : memref<1x32xf32, #tpu.memory_space<vmem>>, vector<1x32xf32>,
    %c2_i32 = arith.constant 2 : i32
    %64 = arith.cmpi eq, %arg0, %c2_i32 : i32
    %65 = arith.extui %64 : i1 to i32
    %c0_i32_32 = arith.constant 0 : i32
    %66 = arith.cmpi ne, %65, %c0_i32_32 : i32
    scf.if %66 {
      %c0_33 = arith.constant 0 : index
      %c0_34 = arith.constant 0 : index
      %67 = vector.load %arg12[%c0_33, %c0_34] : memref<1x32xf32, #tpu.memory_space<vmem>>, vector<1x32xf32>
      %c0_35 = arith.constant 0 : index
      %c0_36 = arith.constant 0 : index
      %68 = vector.load %arg11[%c0_35, %c0_36] : memref<1x1xf32, #tpu.memory_space<vmem>>, vector<1x1xf32>
      %69 = vector.broadcast %68 : vector<1x1xf32> to vector<1x32xf32>
      %70 = arith.divf %67, %69 : vector<1x32xf32>
      %c0_37 = arith.constant 0 : index
      %c0_38 = arith.constant 0 : index
      %71 = vector.load %arg7[%c0_37, %c0_38] : memref<32x2xf32, #tpu.memory_space<vmem>>, vector<32x2xf32>
      %cst_39 = arith.constant dense<0.000000e+00> : vector<1x2xf32>
      %72 = tpu.matmul %70, %71, %cst_39 {dimension_numbers = #tpu.dot_dimension_numbers<[1], [0], [0], [1], [0, 0, 1, 1], [], []>} : vector<1x32xf32>, vector<32x2xf32>, vector<1x2xf32> -> vector<1x2xf32>
      %c0_40 = arith.constant 0 : index
      %c0_41 = arith.constant 0 : index
      %73 = vector.load %arg8[%c0_40, %c0_41] : memref<1x2xf32, #tpu.memory_space<vmem>>, vector<1x2xf32>
      %74 = arith.addf %72, %73 : vector<1x2xf32>
      %c0_42 = arith.constant 0 : index
      %c0_43 = arith.constant 0 : index
      %75 = vector.load %arg9[%c0_42, %c0_43] : memref<1x2xf32, #tpu.memory_space<vmem>>, vector<1x2xf32>
      tpu.vector_store %arg9[%c0_42, %c0_43], %74 {strides = array<i32>} : memref<1x2xf32, #tpu.memory_space<vmem>>, vector<1x2xf32>,
    } else {
    }
    return
  }
  func.func @transform_0(%arg0: i32, %arg1: memref<1xi32, #tpu.memory_space<smem>>) -> (i32, i32) {
    %c0_i32 = arith.constant 0 : i32
    %c0_i32_0 = arith.constant 0 : i32
    return %arg0, %c0_i32 : i32, i32
  }
  func.func @transform_1(%arg0: i32, %arg1: memref<1xi32, #tpu.memory_space<smem>>) -> (i32, i32) {
    %c0_i32 = arith.constant 0 : i32
    %c0_i32_0 = arith.constant 0 : i32
    %c0_i32_1 = arith.constant 0 : i32
    return %c0_i32, %c0_i32_0 : i32, i32
  }
  func.func @transform_2(%arg0: i32, %arg1: memref<1xi32, #tpu.memory_space<smem>>) -> (i32, i32) {
    %c0_i32 = arith.constant 0 : i32
    %c0_i32_0 = arith.constant 0 : i32
    %c0_i32_1 = arith.constant 0 : i32
    return %c0_i32, %c0_i32_0 : i32, i32
  }
  func.func @transform_3(%arg0: i32, %arg1: memref<1xi32, #tpu.memory_space<smem>>) -> (i32, i32) {
    %c0_i32 = arith.constant 0 : i32
    %c0_i32_0 = arith.constant 0 : i32
    %c0_i32_1 = arith.constant 0 : i32
    return %c0_i32, %c0_i32_0 : i32, i32
  }
  func.func @transform_4(%arg0: i32, %arg1: memref<1xi32, #tpu.memory_space<smem>>) -> (i32, i32) {
    %c0_i32 = arith.constant 0 : i32
    %c0_i32_0 = arith.constant 0 : i32
    %c0_i32_1 = arith.constant 0 : i32
    return %c0_i32, %c0_i32_0 : i32, i32
  }
  func.func @transform_5(%arg0: i32, %arg1: memref<1xi32, #tpu.memory_space<smem>>) -> (i32, i32) {
    %c0_i32 = arith.constant 0 : i32
    %c0_i32_0 = arith.constant 0 : i32
    %c0_i32_1 = arith.constant 0 : i32
    return %c0_i32, %c0_i32_0 : i32, i32
  }
  func.func @transform_6(%arg0: i32, %arg1: memref<1xi32, #tpu.memory_space<smem>>) -> (i32, i32) {
    %c0_i32 = arith.constant 0 : i32
    %c0_i32_0 = arith.constant 0 : i32
    %c0_i32_1 = arith.constant 0 : i32
    return %c0_i32, %c0_i32_0 : i32, i32
  }
  func.func @transform_7(%arg0: i32, %arg1: memref<1xi32, #tpu.memory_space<smem>>) -> (i32, i32) {
    %c0_i32 = arith.constant 0 : i32
    %c0_i32_0 = arith.constant 0 : i32
    %c0_i32_1 = arith.constant 0 : i32
    return %c0_i32, %c0_i32_0 : i32, i32
  }
}

</mosaic_0001>

<bundles_post_ra>
// kernel: tpu_custom_call.1
= control target key start
LH: loop header
LB: loop body
LE: loop exit
PB: predicated region body
PF: predicated region fallthrough
CT: control target
= control target key end

     0   :  { %s955_s0 = inlined_call_operand.<no memory space> [shape: s32[1], index: 0, kind: input, shape index: {}]   ;;  %s956_s1 = inlined_call_operand.vmem [shape: f32[48,32], index: 1, kind: input, shape index: {}]   ;;  %s957_s2 = inlined_call_operand.vmem [shape: f32[32,256], index: 2, kind: input, shape index: {}]   ;;  %s958_s3 = inlined_call_operand.vmem [shape: f32[1,256], index: 3, kind: input, shape index: {}]   ;;  %s959_s4 = inlined_call_operand.vmem [shape: f32[1,128], index: 4, kind: input, shape index: {}]   ;;  %s960_s5 = inlined_call_operand.<no memory space> [shape: f32[1,1], index: 5, kind: input, shape index: {}]   ;;  %s961_s6 = inlined_call_operand.vmem [shape: f32[32,2], index: 6, kind: input, shape index: {}]   ;;  %s962_s7 = inlined_call_operand.vmem [shape: f32[1,2], index: 7, kind: input, shape index: {}]   ;;  %s963_s8 = inlined_call_operand.hbm [shape: f32[1,2], index: 8, kind: output, shape index: {}]  }
   0x1   :  { %13 = sst [smem:[#allocation6]] %s955_s0  ;;  %v14_v0 = vstv %s960_s5 }
   0x2   :  { %15 = vst [vmem:[#allocation7] sm:$0x1] %v14_v0 }
   0x3   :  { %16 = vsyncpa [#allocation9], 0  ;;  %s833_s9 = smov 0  }
   0x4 LB: > { %s839_s10 = sadd.s32 4294967295, %s772_s9   ;;  %p658_p0 = scmp.ge.s32.totalorder %s772_s9, 1  ;;  %s772_s9 = sphi %s833_s9, %s22_s9  }
   0x5   : > { %p238_p1 = scmp.lt.s32.totalorder %s772_s9, 4 }
   0x7   : > { %p239_p2 = pnand %p658_p0, %p238_p1 }
   0x8   : > { %s659_s0 = sshll.u32 (!%p239_p2), %s839_s10, 1  ;;  %p661_p4 = scmp.ne.s32.totalorder (!%p239_p2), %s839_s10, 0 }
   0x9   : > { %242 = sbr.rel (%p239_p2) target bundleno = 939 (0x3ab), region = 48  ;;  %p266_p3 = scmp.lt.s32.totalorder (!%p239_p2), %s659_s0, 5 }
   0xe   : > { %s969_s0 = smov (!%p266_p3, %s659_s0), 5  ;;  %274 = sbr.rel (%p661_p4) target bundleno = 22 (0x16), region = 52 }
   0xf   : > { %s660_s5 = sshll.u32 %s969_s0, 3 }
  0x10   : > { %s847_s13 = scalar_lea.vmem %s956_s1, %s660_s5 }
  0x13   : > { %vm275_vm0 = vcmask 0   ;;  %vm278_vm1 = vcmask 253952   ;;  %v774_v1 = vmov -1e+30   ;;  %v775_v2 = vmov 0.0  }
  0x14   : > { %276 = vst.msk [vmem:[#allocation2] sm:$0x1] %vm275_vm0, %v774_v1  ;;  %277 = vst.msk [vmem:[#allocation3] sm:$0x1] %vm275_vm0, %v775_v2 }
  0x15   : > { %279 = vst.msk [vmem:[#allocation4] sm:$0x1] %vm278_vm1, %v775_v2 }
  0x16 PF: > { %v289_v3 = vld [vmem:[%s957_s2 + $0x38] sm:$0xff]  ;;  %v288_v4 = vld [vmem:[%s957_s2 + $0x30] sm:$0xff]  ;;  %v287_v5 = vld [vmem:[%s957_s2 + $0x28] sm:$0xff]  ;;  %vm302_vm2 = vcmask 261120   ;;  %v776_v13 = vmov 0.0   ;;  %v292_v14 = vlaneseq  ;;  %v777_v44 = vmov 0  }
  0x17   : > { %333 = vmatprep.subr.mxu0 %v289_v3  ;;  %689 = vmatprep.subr.mxu1 %v289_v3  ;;  %v286_v6 = vld [vmem:[%s957_s2 + $0x20] sm:$0xff]  ;;  %v285_v7 = vld [vmem:[%s957_s2 + $0x18] sm:$0xff]  ;;  %v284_v8 = vld [vmem:[%s957_s2 + $0x10] sm:$0xff]  ;;  %s420_s12 = sld [smem:[#allocation6]]  ;;  %vm434_vm5 = vcmask 7168   ;;  %vm474_vm6 = vcmask 0  }
  0x18   : > { %334 = vmatpush1.msra.mxu0 %v288_v4  ;;  %693 = vmatpush1.msra.mxu1 %v288_v4  ;;  %v283_v9 = vld [vmem:[%s957_s2 + $0x8] sm:$0xff]  ;;  %v282_v10 = vld [vmem:[%s957_s2] sm:$0xff]  ;;  %v293_v15 = vshrl.u32 %v292_v14, 7  ;;  %vm510_vm7 = vcmask 253952   ;;  %p667_p5 = scmp.ne.s32.totalorder %s839_s10, 2 }
  0x19   : > { %335 = vmatprep.subr.mxu0 %v287_v5  ;;  %690 = vmatprep.subr.mxu1 %v287_v5  ;;  %v875_v11 = vld [vmem:[%s847_s13] sm:$0xff]  ;;  %v878_v12 = vld [vmem:[%s847_s13 + $0x8] sm:$0xff]  ;;  %s666_s13 = sshll.u32 %s839_s10, 4 }
  0x1a   : > { %336 = vmatpush1.msra.mxu0 %v286_v6  ;;  %694 = vmatpush1.msra.mxu1 %v286_v6  ;;  %v298_v16 = vsub.s32 1, %v293_v15  ;;  %v290_v17 = vld [vmem:[%s958_s3] sm:$0x3]  ;;  %v887_v18 = vsub.s32 0, %v293_v15  ;;  %v425_v45 = vstv %s666_s13  ;;  %v424_v46 = vadd.s32 8, %v293_v15 }
  0x1b   : > { %337 = vmatprep.subr.mxu0 %v285_v7  ;;  %691 = vmatprep.subr.mxu1 %v285_v7  ;;  %v664_v37 = vld [vmem:[%s959_s4] ss:$0 sm:$0xff]  ;;  %v665_v47 = vld [vmem:[#allocation7] ss:$0 sm:$0xff]  ;;  %v426_v48 = vadd.s32 %v425_v45, %v293_v15 }
  0x1c   : > { %338 = vmatpush1.msra.mxu0 %v284_v8  ;;  %695 = vmatpush1.msra.mxu1 %v284_v8  ;;  %v299_v19 = vrot.slane %v290_v17, %v298_v16  ;;  %v295_v24 = vrot.slane %v290_v17, %v887_v18  ;;  %v427_v51 = vadd.s32 %v425_v45, %v424_v46  ;;  %v433_v3 = vld [vmem:[#allocation2] sm:$0x1]  ;;  %v498_v46 = vld [vmem:[#allocation4] sm:$0x1] }
  0x1d   : > { %339 = vmatprep.subr.mxu0 %v283_v9  ;;  %692 = vmatprep.subr.mxu1 %v283_v9  ;;  %v428_v49 = vstv %s420_s12 }
  0x1e   : > { %340 = vmatpush1.msra.mxu0 %v282_v10  ;;  %696 = vmatpush1.msra.mxu1 %v282_v10  ;;  %vm894_vm3 = vcmp.lt.s32.totalorder %v426_v48, %v428_v49  ;;  %vm898_vm4 = vcmp.lt.s32.totalorder %v427_v51, %v428_v49 }
  0x1f   : > { %373 = vmatprep.mubr.f32.mxu0 %v776_v13  ;;  %379 = vmatprep.mubr.f32.mxu1 %v776_v13 }
  0x20   : > { %662 = vmatmul.mubr.msk.f32.vlgmr.msra.gmra.mxu0 %vm302_vm2, %v875_v11  ;;  %663 = vmatmul.mubr.msk.f32.vlgmr.msra.gmra.mxu1 %vm302_vm2, %v878_v12 }
  0x21   : > { %720 = vset.pattern.permute.xlu0 %v777_v44  ;;  %719 = vset.pattern.permute.xlu1 %v777_v44 }
  0xe0   : > { %v375_v20 = vpop.f32.mrf.mxu0  ;;  %v381_v21 = vpop.f32.mrf.mxu1 }
  0xe1   : > { %v376_v29 = vadd.f32 %v375_v20, %v295_v24  ;;  %v382_v30 = vadd.f32 %v381_v21, %v295_v24 }
  0xe2   : > { %v377_v22 = vpop.f32.mrf.mxu0  ;;  %v383_v23 = vpop.f32.mrf.mxu1 }
  0xe3   : > { %v378_v25 = vadd.f32 %v377_v22, %v299_v19  ;;  %v384_v26 = vadd.f32 %v383_v23, %v299_v19 }
  0xe5   : > { %v388_v27 = vmul.f32 0.5, %v378_v25  ;;  %v389_v28 = vmul.f32 0.5, %v384_v26 }
  0xe7   : > { %721 = vtanh.f32 %v388_v27 }
  0xe8   : > { %723 = vtanh.f32 %v389_v28  ;;  %v462_v28 = vld [vmem:[#allocation3] sm:$0x1] }
  0xe9   : > { %725 = vtanh.f32 %v376_v29 }
  0xea   : > { %727 = vtanh.f32 %v382_v30 }
  0xf4   : > { %v722_v31 = vpop.eup %721 }
  0xf5   : > { %v724_v32 = vpop.eup %723  ;;  %v392_v33 = vadd.f32 1.0, %v722_v31 }
  0xf6   : > { %v393_v34 = vadd.f32 1.0, %v724_v32  ;;  %v726_v36 = vpop.eup %725 }
  0xf7   : > { %v394_v35 = vmul.f32 0.5, %v392_v33  ;;  %v728_v40 = vpop.eup %727 }
  0xf8   : > { %v395_v38 = vmul.f32 0.5, %v393_v34 }
  0xf9   : > { %v396_v39 = vmul.f32 %v726_v36, %v394_v35 }
  0xfa   : > { %v397_v42 = vmul.f32 %v728_v40, %v395_v38 }
  0xfb   : > { %v405_v41 = vmul.f32 %v664_v37, %v396_v39 }
  0xfc   : > { %v406_v43 = vmul.f32 %v664_v37, %v397_v42 }
  0xfd   : > { %407 = vadd.xlane.f32.xlu0 %v405_v41 }
 0x101   : > { %409 = vadd.xlane.f32.xlu0 %v406_v43 }
 0x186   : > { %v408_v50 = vpop.xlane.xlu0 %407 }
 0x187   : > { %v418_v52 = vadd.f32 %v665_v47, %v408_v50 }
 0x189   : > { %v431_v56 = vsel %vm894_vm3, %v418_v52, -1e+30 }
 0x18a   : > { %v410_v55 = vpop.xlane.xlu0 %409  ;;  %v435_v59 = vsel %vm434_vm5, %v431_v56, -inf }
 0x18b   : > { %v419_v57 = vadd.f32 %v665_v47, %v410_v55 }
 0x18d   : > { %v432_v58 = vsel %vm898_vm4, %v419_v57, -1e+30 }
 0x18e   : > { %v436_v60 = vsel %vm434_vm5, %v432_v58, -inf }
 0x18f   : > { %v437_v61 = vmax.f32 %v435_v59, %v436_v60 }
 0x191   : > { %v438_v62 = vrot.slane %v437_v61, 4 }
 0x193   : > { %v439_v63 = vmax.f32 %v437_v61, %v438_v62 }
 0x195   : > { %v440_v0 = vrot.slane %v439_v63, 2 }
 0x197   : > { %v441_v1 = vmax.f32 %v439_v63, %v440_v0 }
 0x199   : > { %v442_v2 = vrot.slane %v441_v1, 1 }
 0x19b   : > { %v443_v4 = vmax.f32 %v441_v1, %v442_v2 }
 0x19d   : > { %v444_v5 = vmax.f32 %v433_v3, %v443_v4 }
 0x19f   : > { %v445_v6 = vsub.f32 %v433_v3, %v444_v5  ;;  %v452_v7 = vrot.slane %v444_v5, %v887_v18  ;;  %476 = vst.msk [vmem:[#allocation2] sm:$0x1] %vm474_vm6, %v444_v5 }
 0x1a1   : > { %v446_v8 = vmul.f32 1.442695, %v445_v6  ;;  %v454_v9 = vsub.f32 %v431_v56, %v452_v7  ;;  %v455_v10 = vsub.f32 %v432_v58, %v452_v7 }
 0x1a3   : > { %729 = vpow2.f32 %v446_v8  ;;  %v456_v13 = vmul.f32 1.442695, %v454_v9  ;;  %v458_v14 = vmul.f32 1.442695, %v455_v10 }
 0x1a5   : > { %731 = vpow2.f32 %v456_v13 }
 0x1a6   : > { %733 = vpow2.f32 %v458_v14 }
 0x1b0   : > { %v730_v15 = vpop.eup %729 }
 0x1b1   : > { %501 = vperm.xlu0 %720, %v730_v15   ;;  %v463_v30 = vmul.f32 %v730_v15, %v462_v28 }
 0x1b2   : > { %v732_v16 = vpop.eup %731 }
 0x1b3   : > { %v734_v17 = vpop.eup %733  ;;  %v460_v19 = vsel %vm894_vm3, %v732_v16, 0.0 }
 0x1b4   : > { %479 = vperm.xlu1 %719, %v460_v19   ;;  %v464_v20 = vsel %vm434_vm5, %v460_v19, 0.0  ;;  %v461_v21 = vsel %vm898_vm4, %v734_v17, 0.0 }
 0x1b5   : > { %v465_v22 = vsel %vm434_vm5, %v461_v21, 0.0 }
 0x1b6   : > { %v466_v23 = vadd.f32 %v465_v22, %v464_v20 }
 0x1b8   : > { %484 = vperm.xlu1 %719, %v461_v21   ;;  %v467_v24 = vrot.slane %v466_v23, 4 }
 0x1ba   : > { %v468_v25 = vadd.f32 %v467_v24, %v466_v23 }
 0x1bc   : > { %v469_v26 = vrot.slane %v468_v25, 2 }
 0x1be   : > { %v470_v27 = vadd.f32 %v469_v26, %v468_v25 }
 0x1c0   : > { %v471_v29 = vrot.slane %v470_v27, 1 }
 0x1c2   : > { %v472_v31 = vadd.f32 %v471_v29, %v470_v27 }
 0x1c4   : > { %v473_v32 = vadd.f32 %v472_v31, %v463_v30 }
 0x1c6   : > { %475 = vst.msk [vmem:[#allocation3] sm:$0x1] %vm474_vm6, %v473_v32 }
 0x22c   : > { %v502_v42 = vpop.permute.xlu0 %501 }
 0x22d   : > { %v507_v44 = vrot.slane %v502_v42, %v887_v18 }
 0x22f   : > { %v480_v33 = vpop.permute.xlu1 %479  ;;  %v508_v48 = vmul.f32 %v507_v44, %v498_v46 }
 0x230   : > { %v487_v34 = vmul.f32 %v480_v33, %v875_v11 }
 0x232   : > { %v489_v37 = vsel %vm302_vm2, %v487_v34, 0.0 }
 0x233   : > { %v485_v35 = vpop.permute.xlu1 %484 }
 0x234   : > { %v488_v36 = vmul.f32 %v485_v35, %v878_v12 }
 0x236   : > { %v490_v38 = vsel %vm302_vm2, %v488_v36, 0.0 }
 0x237   : > { %v491_v39 = vadd.f32 %v490_v38, %v489_v37 }
 0x239   : > { %v492_v40 = vrot.slane %v491_v39, 4 }
 0x23b   : > { %v493_v41 = vadd.f32 %v492_v40, %v491_v39 }
 0x23d   : > { %v494_v43 = vrot.slane %v493_v41, 2 }
 0x23f   : > { %v495_v45 = vadd.f32 %v494_v43, %v493_v41 }
 0x241   : > { %v496_v47 = vrot.slane %v495_v45, 1 }
 0x243   : > { %v497_v49 = vadd.f32 %v496_v47, %v495_v45  ;;  %515 = sbr.rel (%p667_p5) target bundleno = 924 (0x39c), region = 56 }
 0x245   : > { %v509_v11 = vadd.f32 %v508_v48, %v497_v49 }
 0x247   : > { %511 = vst.msk [vmem:[#allocation4] sm:$0x1] %vm510_vm7, %v509_v11 }
 0x248   : > { %v517_v12 = vld [vmem:[#allocation3] sm:$0x1]  ;;  %v532_v50 = vld [vmem:[%s961_s6 + $0x18] sm:$0xff]  ;;  %v778_v51 = vmov 0   ;;  %v779_v52 = vmov 0.0   ;;  %v531_v53 = vld [vmem:[%s961_s6 + $0x10] sm:$0xff] }
 0x249   : > { %735 = vset.pattern.permute.xlu0 %v778_v51  ;;  %678 = vmatprep.subr.mxu0 %v779_v52  ;;  %v530_v54 = vld [vmem:[%s961_s6 + $0x8] sm:$0xff]  ;;  %vm780_vm8 = vmmov 0   ;;  %v529_v55 = vld [vmem:[%s961_s6] sm:$0xff]  ;;  %vm607_vm9 = vcmask 8192  }
 0x24a   : > { %520 = vperm.xlu0 %735, %v517_v12   ;;  %679 = vmatpush3.msra.mxu0 %v532_v50  ;;  %v533_v61 = vld [vmem:[%s962_s7] sm:$0x1] }
 0x24b   : > { %680 = vmatprep.subr.mxu0 %v779_v52  ;;  %686 = vmatprep.mubr.msk.f32.mxu0 %vm780_vm8, %v779_v52 }
 0x24c   : > { %681 = vmatpush3.msra.mxu0 %v531_v53 }
 0x24d   : > { %682 = vmatprep.subr.mxu0 %v779_v52 }
 0x24e   : > { %683 = vmatpush3.msra.mxu0 %v530_v54  ;;  %v516_v58 = vld [vmem:[#allocation4] sm:$0x1] }
 0x24f   : > { %684 = vmatprep.subr.mxu0 %v779_v52 }
 0x250   : > { %685 = vmatpush3.msra.mxu0 %v529_v55 }
 0x2c5   : > { %v521_v56 = vpop.permute.xlu0 %520 }
 0x2c6   : > { %v526_v57 = vrot.slane %v521_v56, %v887_v18 }
 0x2c8   : > { %736 = vrcp.f32 %v526_v57 }
 0x2d5   : > { %v737_v59 = vpop.eup %736 }
 0x2d6   : > { %v528_v60 = vmul.f32 %v737_v59, %v516_v58 }
 0x2d8   : > { %687 = vmatmul.mubr.msk.f32.vlgmr.msra.gmra.mxu0 %vm302_vm2, %v528_v60 }
 0x398   : > { %v603_v62 = vpop.f32.mrf.mxu0 }
 0x399   : > { %v604_v63 = vadd.f32 %v603_v62, %v533_v61 }
 0x39a   : > { %v688_v0 = vpop.f32.mrf.mxu0 }
 0x39b   : > { %608 = vst.msk [vmem:[#allocation8] sm:$0x1] %vm607_vm9, %v604_v63 }
 0x39c PF: > { %p701_p6 = scmp.eq.s32.totalorder %s839_s10, 2  ;;  %s781_s24 = smov [#allocation8]  }
 0x39d   : > { %s616_s25 = sshll.u32 %s781_s24, 4  ;;  %s617_s25 = int_to_ptr.vmem [resolvable:$true] %s616_s25 }
 0x39e   : > { %s738_s26 = scalar_lea.vmem %s617_s25, 16  ;;  %s744_s27 = scalar_lea.vmem %s617_s25, 32 }
 0x39f   : > { %p739_p7 = scmp.ne.s32.totalorder %s617_s25, %s738_s26  ;;  %p745_p10 = scmp.lt.s32.totalorder %s617_s25, %s617_s25 }
 0x3a0   : > { %p746_p11 = scmp.lt.s32.totalorder %s744_s27, %s738_s26 }
 0x3a1   : > { %p740_p8 = pnand %p739_p7, %p701_p6 }
 0x3a2   : > { %p747_p12 = por %p746_p11, %p745_p10 }
 0x3a3   : > { %p741_p9 = pneg %p740_p8 }
 0x3a5   : > { %p748_p13 = pnand %p747_p12, %p741_p9 }
 0x3a7   : > { %751 = shalt.err (!%p748_p13)
}
 0x3a8   : > { %698 = dma.vmem_to_hbm [thread:$0]  (%p701_p6), %s617_s25, 16, %s963_s8, [#allocation9]  }
 0x3a9   : > { %767 = dma.done.wait (%p701_p6), [#allocation9], 16  }
 0x3aa   : > { %769 = vsyncadd (%p701_p6), [#allocation9], 4294967280 }
 0x3ab PF: > { %s22_s9 = sadd.s32 1, %s772_s9  }
 0x3ac   : > { %p19_p0 = scmp.ge.s32.totalorder %s22_s9, 5  }
 0x3ae   :  { %21 = sbr.rel (!%p19_p0) target bundleno = 4 (0x4), region = 83 }
 0x3b3   :  { %629 = vsyncpa [#allocation9], 1 }
 0x3b4   :  { %631 = vsyncpa [#allocation9 + $0x1], 1 }

</bundles_post_ra>
